<compile_context>
chip_gen: v7x
topology: tpu7x:2x2x1
jax: 0.10.0
libtpu: 0.0.40
codegen_flags: <defaults>
</compile_context>

<pallas_src>
import jax
import jax.numpy as jnp
from jax.experimental import pallas as pl
from jax.experimental.pallas import tpu as pltpu


def _round_up(v, m):
    return (v + m - 1) // m * m


def _am_kernel(x_ref, w_ref, o_ref, w_bf16_ref, inv_wnorm_ref):
    eps = 1e-12  # torch.nn.functional.normalize default eps

    # Once per C tile (inner N axis == 0): f32 column inv-norms of the W tile
    # and a bf16 copy of it for the MXU.  The W tile is resident across all
    # inner N iterations, so this work is amortized over the whole N sweep.
    @pl.when(pl.program_id(1) == 0)
    def _():
        w = w_ref[...]                                          # (D, TC) f32
        col_sumsq = jnp.sum(w * w, axis=0, keepdims=True)       # (1, TC)
        inv_wnorm_ref[...] = jax.lax.rsqrt(jnp.maximum(col_sumsq, eps * eps))
        w_bf16_ref[...] = w.astype(jnp.bfloat16)

    # Per-step hot path.
    x = x_ref[...]                                              # (TM, D) f32
    row_sumsq = jnp.sum(x * x, axis=1, keepdims=True)           # (TM, 1)
    inv_xnorm = jax.lax.rsqrt(jnp.maximum(row_sumsq, eps * eps))

    # bf16 MXU matmul with f32 accumulation, then post-matmul normalization.
    acc = jnp.dot(x.astype(jnp.bfloat16), w_bf16_ref[...],
                  preferred_element_type=jnp.float32)           # (TM, TC) f32
    out = acc * inv_xnorm * inv_wnorm_ref[...]
    o_ref[...] = jnp.clip(out, -1.0, 1.0).astype(o_ref.dtype)


def am_layer_forward(x, weight, *, tm=256, tc=512):
    """x: (N, D) float32, weight: (D, C) float32 -> (N, C) float32."""
    n, d = x.shape
    d2, c = weight.shape
    assert d == d2, "inputDim mismatch between x and weight"

    # Tile sizes: TM multiple of 8 (sublanes), TC multiple of 128 (lane-dense
    # output stores).  Shrink to the (padded) problem size for small inputs.
    tm = min(tm, _round_up(n, 8))
    tc = min(tc, _round_up(c, 128))

    n_pad = _round_up(n, tm)
    c_pad = _round_up(c, tc)
    if n_pad != n:
        x = jnp.pad(x, ((0, n_pad - n), (0, 0)))
    if c_pad != c:
        weight = jnp.pad(weight, ((0, 0), (0, c_pad - c)))

    grid = (c_pad // tc, n_pad // tm)  # (C tiles outer, N tiles inner)

    # VMEM budget estimate (double-buffered x/W/out f32 tiles + bf16 W scratch
    # + inv-norm scratch + headroom); clamped under v7x's 64 MiB physical VMEM.
    vmem_bytes = (2 * tm * d * 4 + 2 * d * tc * 4 + 2 * tm * tc * 4
                  + d * tc * 2 + 8 * tc * 4 + (2 << 20))
    vmem_limit = min(vmem_bytes, 60 << 20)

    out = pl.pallas_call(
        _am_kernel,
        out_shape=jax.ShapeDtypeStruct((n_pad, c_pad), jnp.float32),
        grid_spec=pltpu.PrefetchScalarGridSpec(
            num_scalar_prefetch=0,
            grid=grid,
            in_specs=[
                # x tile: constant along the C axis (re-fetched per N tile only)
                pl.BlockSpec((tm, d), lambda j, i: (i, 0)),
                # W tile: constant along the inner N axis -> DMA'd once per C tile
                pl.BlockSpec((d, tc), lambda j, i: (0, j)),
            ],
            out_specs=pl.BlockSpec((tm, tc), lambda j, i: (i, j)),
            scratch_shapes=[
                pltpu.VMEM((d, tc), jnp.bfloat16),   # bf16 W tile (per C tile)
                pltpu.VMEM((1, tc), jnp.float32),    # W column inv-norms
            ],
        ),
        compiler_params=pltpu.CompilerParams(
            dimension_semantics=("parallel", "arbitrary"),
            vmem_limit_bytes=vmem_limit,
        ),
    )(x, weight)

    return out[:n, :c]


def make_am_weight(key, input_dim, class_num):
    """Deterministic stand-in for xavier_normal init of Parameter(inputDim, classNum)."""
    std = (2.0 / (input_dim + class_num)) ** 0.5
    return std * jax.random.normal(key, (input_dim, class_num), dtype=jnp.float32)


def am_layer_reference(x, weight):
    eps = 1e-12
    xh = x / jnp.maximum(jnp.linalg.norm(x, axis=1, keepdims=True), eps)
    wh = weight / jnp.maximum(jnp.linalg.norm(weight, axis=0, keepdims=True), eps)
    return jnp.clip(xh @ wh, -1.0, 1.0)


if __name__ == "__main__":
    key = jax.random.PRNGKey(0)
    k_x, k_w = jax.random.split(key)

    batch = 8
    input_dim = 32   # inputDim
    class_num = 16   # classNum

    x = jax.random.normal(k_x, (batch, input_dim), dtype=jnp.float32)
    weight = make_am_weight(k_w, input_dim, class_num)

    out = am_layer_forward(x, weight)
    out = jax.block_until_ready(out)

    ref = am_layer_reference(x, weight)
    assert out.shape == (batch, class_num)
    # bf16 MXU inputs with f32 accumulation -> slightly looser tolerance.
    assert jnp.allclose(out, ref, atol=1e-2, rtol=0.0)

    print("KERNEL_OK")
</pallas_src>

<mosaic_0001>
module attributes {stable_mosaic.version = 11 : i64} {
  func.func @_am_kernel(%arg0: i32, %arg1: i32, %arg2: memref<8x32xf32, #tpu.memory_space<vmem>>, %arg3: memref<32x128xf32, #tpu.memory_space<vmem>>, %arg4: memref<8x128xf32, #tpu.memory_space<vmem>>, %arg5: memref<32x128xbf16, #tpu.memory_space<vmem>>, %arg6: memref<1x128xf32, #tpu.memory_space<vmem>>) attributes {dimension_semantics = [#tpu.dimension_semantics<parallel>, #tpu.dimension_semantics<arbitrary>], iteration_bounds = array<i64: 1, 1>, scalar_prefetch = 0 : i64, scratch_operands = 2 : i64, tpu.core_type = #tpu.core_type<tc>, window_params = [{transform_indices = @transform_0, window_bounds = array<i64: 8, 32>}, {transform_indices = @transform_1, window_bounds = array<i64: 32, 128>}, {transform_indices = @transform_2, window_bounds = array<i64: 8, 128>}]} {
    %c0_i32 = arith.constant 0 : i32
    %0 = arith.cmpi eq, %arg1, %c0_i32 : i32
    %1 = arith.extui %0 : i1 to i32
    %c0_i32_0 = arith.constant 0 : i32
    %2 = arith.cmpi ne, %1, %c0_i32_0 : i32
    scf.if %2 {
      %c0_12 = arith.constant 0 : index
      %c0_13 = arith.constant 0 : index
      %23 = vector.load %arg3[%c0_12, %c0_13] : memref<32x128xf32, #tpu.memory_space<vmem>>, vector<32x128xf32>
      %24 = arith.mulf %23, %23 : vector<32x128xf32>
      %cst_14 = arith.constant dense<0.000000e+00> : vector<128xf32>
      %25 = vector.multi_reduction <add>, %24, %cst_14 [0] : vector<32x128xf32> to vector<128xf32>
      %26 = vector.shape_cast %25 : vector<128xf32> to vector<1x128xf32>
      %cst_15 = arith.constant 1.000000e-24 : f32
      %27 = vector.broadcast %cst_15 : f32 to vector<1x128xf32>
      %28 = arith.maximumf %26, %27 : vector<1x128xf32>
      %29 = math.rsqrt %28 : vector<1x128xf32>
      %c0_16 = arith.constant 0 : index
      %c0_17 = arith.constant 0 : index
      %30 = vector.load %arg6[%c0_16, %c0_17] : memref<1x128xf32, #tpu.memory_space<vmem>>, vector<1x128xf32>
      tpu.vector_store %arg6[%c0_16, %c0_17], %29 {strides = array<i32>} : memref<1x128xf32, #tpu.memory_space<vmem>>, vector<1x128xf32>,
      %31 = arith.truncf %23 : vector<32x128xf32> to vector<32x128xbf16>
      %c0_18 = arith.constant 0 : index
      %c0_19 = arith.constant 0 : index
      %32 = vector.load %arg5[%c0_18, %c0_19] : memref<32x128xbf16, #tpu.memory_space<vmem>>, vector<32x128xbf16>
      tpu.vector_store %arg5[%c0_18, %c0_19], %31 {strides = array<i32>} : memref<32x128xbf16, #tpu.memory_space<vmem>>, vector<32x128xbf16>,
    } else {
    }
    %c0 = arith.constant 0 : index
    %c0_1 = arith.constant 0 : index
    %3 = vector.load %arg2[%c0, %c0_1] : memref<8x32xf32, #tpu.memory_space<vmem>>, vector<8x32xf32>
    %4 = arith.mulf %3, %3 : vector<8x32xf32>
    %cst = arith.constant dense<0.000000e+00> : vector<8xf32>
    %5 = vector.multi_reduction <add>, %4, %cst [1] : vector<8x32xf32> to vector<8xf32>
    %6 = vector.shape_cast %5 : vector<8xf32> to vector<8x1xf32>
    %cst_2 = arith.constant 1.000000e-24 : f32
    %7 = vector.broadcast %cst_2 : f32 to vector<8x1xf32>
    %8 = arith.maximumf %6, %7 : vector<8x1xf32>
    %9 = math.rsqrt %8 : vector<8x1xf32>
    %10 = arith.truncf %3 : vector<8x32xf32> to vector<8x32xbf16>
    %c0_3 = arith.constant 0 : index
    %c0_4 = arith.constant 0 : index
    %11 = vector.load %arg5[%c0_3, %c0_4] : memref<32x128xbf16, #tpu.memory_space<vmem>>, vector<32x128xbf16>
    %cst_5 = arith.constant dense<0.000000e+00> : vector<8x128xf32>
    %12 = tpu.matmul %10, %11, %cst_5 {dimension_numbers = #tpu.dot_dimension_numbers<[1], [0], [0], [1], [0, 0, 1, 1], [], []>} : vector<8x32xbf16>, vector<32x128xbf16>, vector<8x128xf32> -> vector<8x128xf32>
    %13 = vector.broadcast %9 : vector<8x1xf32> to vector<8x128xf32>
    %14 = arith.mulf %12, %13 : vector<8x128xf32>
    %c0_6 = arith.constant 0 : index
    %c0_7 = arith.constant 0 : index
    %15 = vector.load %arg6[%c0_6, %c0_7] : memref<1x128xf32, #tpu.memory_space<vmem>>, vector<1x128xf32>
    %16 = vector.broadcast %15 : vector<1x128xf32> to vector<8x128xf32>
    %17 = arith.mulf %14, %16 : vector<8x128xf32>
    %cst_8 = arith.constant -1.000000e+00 : f32
    %cst_9 = arith.constant 1.000000e+00 : f32
    %18 = vector.broadcast %cst_8 : f32 to vector<8x128xf32>
    %19 = arith.maximumf %18, %17 : vector<8x128xf32>
    %20 = vector.broadcast %cst_9 : f32 to vector<8x128xf32>
    %21 = arith.minimumf %20, %19 : vector<8x128xf32>
    %c0_10 = arith.constant 0 : index
    %c0_11 = arith.constant 0 : index
    %22 = vector.load %arg4[%c0_10, %c0_11] : memref<8x128xf32, #tpu.memory_space<vmem>>, vector<8x128xf32>
    tpu.vector_store %arg4[%c0_10, %c0_11], %21 {strides = array<i32>} : memref<8x128xf32, #tpu.memory_space<vmem>>, vector<8x128xf32>,
    return
  }
  func.func @transform_0(%arg0: i32, %arg1: i32) -> (i32, i32) {
    %c0_i32 = arith.constant 0 : i32
    %c0_i32_0 = arith.constant 0 : i32
    return %arg1, %c0_i32 : i32, i32
  }
  func.func @transform_1(%arg0: i32, %arg1: i32) -> (i32, i32) {
    %c0_i32 = arith.constant 0 : i32
    %c0_i32_0 = arith.constant 0 : i32
    return %c0_i32, %arg0 : i32, i32
  }
  func.func @transform_2(%arg0: i32, %arg1: i32) -> (i32, i32) {
    %c0_i32 = arith.constant 0 : i32
    return %arg1, %arg0 : i32, i32
  }
}

</mosaic_0001>

<bundles_post_ra>
// kernel: tpu_custom_call.1
= control target key start
LH: loop header
LB: loop body
LE: loop exit
PB: predicated region body
PF: predicated region fallthrough
CT: control target
= control target key end

     0   :  { %7 = vsyncpa [#allocation5], 0  ;;  %s311_s0 = inlined_call_operand.hbm [shape: f32[8,32], index: 0, kind: input, shape index: {}]   ;;  %s312_s1 = inlined_call_operand.hbm [shape: f32[32,128], index: 1, kind: input, shape index: {}]   ;;  %s313_s2 = inlined_call_operand.hbm [shape: f32[8,128], index: 2, kind: output, shape index: {}]  }
   0x1   :  { %8 = vsyncpa [#allocation8], 0 }
   0x2   :  { %9 = vsyncpa [#allocation6], 0  ;;  %s246_s9 = smov [#allocation4]   ;;  %s247_s11 = smov [#allocation7]  }
   0x3   :  { %s16_s10 = sshll.u32 %s246_s9, 4  ;;  %s25_s12 = sshll.u32 %s247_s11, 4  ;;  %s17_s10 = int_to_ptr.vmem [resolvable:$true] %s16_s10  ;;  %s268_s12 = int_to_ptr.vmem [resolvable:$true] %s25_s12 }
   0x4   :  { %s174_s15 = scalar_lea.hbm %s311_s0, 128 }
   0x5   :  { %p175_p0 = scmp.ne.s32.totalorder %s311_s0, %s174_s15  ;;  %p178_p1 = scmp.lt.u32.totalorder %s174_s15, %s311_s0 }
   0x7   :  { %p180_p2 = pnand %p178_p1, %p175_p0 }
   0x9   :  { %183 = shalt.err (!%p180_p2)
}
   0xa   :  { %s184_s20 = scalar_lea.vmem %s17_s10, 128  ;;  %p189_p4 = scmp.lt.s32.totalorder %s17_s10, %s17_s10 }
   0xb   :  { %p185_p3 = scmp.ne.s32.totalorder %s17_s10, %s184_s20  ;;  %p190_p5 = scmp.lt.s32.totalorder %s184_s20, %s184_s20 }
   0xd   :  { %p191_p6 = por %p190_p5, %p189_p4 }
   0xf   :  { %p192_p7 = pnand %p191_p6, %p185_p3 }
  0x11   :  { %195 = shalt.err (!%p192_p7)
}
  0x12   :  { %19 = dma.hbm_to_vmem [thread:$0]  %s311_s0, 128, %s17_s10, [#allocation5]  }
  0x13   :  { %s196_s25 = scalar_lea.hbm %s312_s1, 512 }
  0x14   :  { %p197_p8 = scmp.ne.s32.totalorder %s312_s1, %s196_s25  ;;  %p200_p9 = scmp.lt.u32.totalorder %s196_s25, %s312_s1 }
  0x16   :  { %p202_p10 = pnand %p200_p9, %p197_p8 }
  0x18   :  { %205 = shalt.err (!%p202_p10)
}
  0x19   :  { %s206_s30 = scalar_lea.vmem %s268_s12, 512  ;;  %p211_p12 = scmp.lt.s32.totalorder %s268_s12, %s268_s12 }
  0x1a   :  { %p207_p11 = scmp.ne.s32.totalorder %s268_s12, %s206_s30  ;;  %p212_p13 = scmp.lt.s32.totalorder %s206_s30, %s206_s30 }
  0x1c   :  { %p213_p0 = por %p212_p13, %p211_p12 }
  0x1e   :  { %p214_p1 = pnand %p213_p0, %p207_p11 }
  0x20   :  { %217 = shalt.err (!%p214_p1)
}
  0x21   :  { %s248_s0 = smov 128   ;;  %s249_s3 = smov 8  }
  0x22   :  { %31 = dma.hbm_to_vmem [thread:$0]  %s312_s1, 512, %s268_s12, [#allocation8], %s248_s0, %s248_s0, %s249_s3  }
  0x23   :  { %240 = dma.done.wait [#allocation5], 128  }
  0x24   :  { %241 = vsyncadd [#allocation5], 4294967168 }
  0x25   :  { %242 = dma.done.wait [#allocation8], 512  }
  0x26   :  { %243 = vsyncadd [#allocation8], 4294966784  ;;  %v250_v0 = vmov 0.0   ;;  %vm251_vm0 = vmmov 0   ;;  %v43_v1 = vld [vmem:[#allocation7] sm:$0xff]  ;;  %v44_v2 = vld [vmem:[#allocation7 + $0x8] sm:$0xff] }
  0x27   :  { %155 = vmatprep.subr.bf16.mxu0 %v250_v0  ;;  %159 = vmatprep.mubr.msk.bf16.mxu0 %vm251_vm0, %v250_v0  ;;  %v45_v3 = vld [vmem:[#allocation7 + $0x10] sm:$0xff]  ;;  %v47_v4 = vmul.f32 %v43_v1, %v43_v1  ;;  %v48_v5 = vmul.f32 %v44_v2, %v44_v2  ;;  %v63_v6 = vpack.c.bf16 %v44_v2, %v43_v1  ;;  %v46_v7 = vld [vmem:[#allocation7 + $0x18] sm:$0xff]  ;;  %vm69_vm1 = vcmask 261120   ;;  %s252_s1 = smov [#allocation9]  }
  0x28   :  { %v49_v8 = vmul.f32 %v45_v3, %v45_v3  ;;  %v67_v9 = vld [vmem:[#allocation4] sm:$0xff]  ;;  %v50_v12 = vmul.f32 %v46_v7, %v46_v7  ;;  %v64_v13 = vpack.c.bf16 %v46_v7, %v45_v3  ;;  %s139_s6 = sshll.u32 %s252_s1, 4  ;;  %s140_s6 = int_to_ptr.vmem [resolvable:$true] %s139_s6 }
  0x29   :  { %v68_v10 = vmul.f32 %v67_v9, %v67_v9  ;;  %v51_v11 = vadd.f32 %v48_v5, %v47_v4  ;;  %156 = vmatpush3.bf16.msra.mxu0 %v63_v6  ;;  %v75_v16 = vpack.c.bf16 %v67_v9, %v67_v9  ;;  %s218_s7 = scalar_lea.vmem %s140_s6, 128  ;;  %p223_p3 = scmp.lt.s32.totalorder %s140_s6, %s140_s6 }
  0x2a   :  { %157 = vmatprep.subr.bf16.mxu0 %v250_v0  ;;  %p219_p2 = scmp.ne.s32.totalorder %s140_s6, %s218_s7  ;;  %p224_p4 = scmp.lt.s32.totalorder %s218_s7, %s218_s7 }
  0x2b   :  { %v70_v14 = vsel %vm69_vm1, %v68_v10, 0.0  ;;  %v52_v15 = vadd.f32 %v51_v11, %v49_v8 }
  0x2c   :  { %71 = vadd.xlane.f32.xlu0 %v70_v14  ;;  %p225_p5 = por %p224_p4, %p223_p3 }
  0x2d   :  { %v53_v17 = vadd.f32 %v52_v15, %v50_v12  ;;  %158 = vmatpush3.bf16.msra.mxu0 %v64_v13 }
  0x2e   :  { %p226_p6 = pnand %p225_p5, %p219_p2 }
  0x2f   :  { %v54_v18 = vrot.slane %v53_v17, 4 }
  0x30   :  { %160 = vmatmul.mubr.msk.bf16.vlgmr.msra.gmra.mrb[0].mxu0 %vm69_vm1, %v75_v16 }
  0x31   :  { %v55_v19 = vadd.f32 %v54_v18, %v53_v17 }
  0x33   :  { %v56_v20 = vrot.slane %v55_v19, 2 }
  0x35   :  { %v57_v21 = vadd.f32 %v56_v20, %v55_v19 }
  0x37   :  { %v58_v22 = vrot.slane %v57_v21, 1 }
  0x39   :  { %v59_v23 = vadd.f32 %v58_v22, %v57_v21 }
  0x3b   :  { %v60_v24 = vmax.f32 %v59_v23, 1e-24 }
  0x3d   :  { %170 = vrsqrt.f32 %v60_v24 }
  0x47   :  { %v171_v25 = vpop.eup %170 }
  0x48   :  { %62 = vst [vmem:[#allocation3] sm:$0x1] %v171_v25 }
  0x4f   :  { %v150_v30 = vld [vmem:[#allocation3] ss:$0 sm:$0xff] }
  0xb9   :  { %v72_v26 = vpop.xlane.xlu0 %71 }
  0xba   :  { %v73_v27 = vmax.f32 %v72_v26, 1e-24 }
  0xbc   :  { %172 = vrsqrt.f32 %v73_v27 }
  0xc6   :  { %v173_v28 = vpop.eup %172 }
 0x103   :  { %v115_v29 = vpop.f32.mrb[0].mxu0 }
 0x104   :  { %v121_v31 = vmul.f32 %v173_v28, %v115_v29  ;;  %v161_v32 = vpop.f32.mrb[1].mxu0 }
 0x105   :  { %v118_v33 = vpop.f32.mrb[2].mxu0 }
 0x106   :  { %v129_v34 = vmul.f32 %v150_v30, %v121_v31  ;;  %v162_v35 = vpop.f32.mrb[3].mxu0 }
 0x108   :  { %v151_v36 = vclamps-f32 %v129_v34, 1.0 }
 0x10a   :  { %132 = vst [vmem:[#allocation9] sm:$0xff] %v151_v36 }
 0x10b   :  { %229 = shalt.err (!%p226_p6)
}
 0x10c   :  { %s230_s10 = scalar_lea.hbm %s313_s2, 128 }
 0x10d   :  { %p231_p7 = scmp.ne.s32.totalorder %s313_s2, %s230_s10  ;;  %p234_p8 = scmp.lt.u32.totalorder %s230_s10, %s313_s2 }
 0x10f   :  { %p236_p9 = pnand %p234_p8, %p231_p7 }
 0x111   :  { %239 = shalt.err (!%p236_p9)
}
 0x112   :  { %142 = dma.vmem_to_hbm [thread:$0]  %s140_s6, 128, %s313_s2, [#allocation6]  }
 0x113   :  { %244 = dma.done.wait [#allocation6], 128  }
 0x114   :  { %245 = vsyncadd [#allocation6], 4294967168 }
 0x115   :  { %146 = vsyncpa [#allocation5], 1 }
 0x116   :  { %147 = vsyncpa [#allocation8], 1 }
 0x117   :  { %148 = vsyncpa [#allocation6], 1 }

</bundles_post_ra>
